<compile_context>
chip_gen: v6e
topology: v6e:2x2x1
jax: 0.10.0
libtpu: 0.0.40
codegen_flags: <defaults>
</compile_context>

<pallas_src>
import functools

import jax
import jax.numpy as jnp
from jax.experimental import pallas as pl
from jax.experimental.pallas import tpu as pltpu


def _fullmodel_kernel(x_ref, y_ref, w_ref, b_ref, logits_ref, ce_ref):
    """One grid step over a lane-dense tile of TM pixels (channel-major).

    x_ref      : (C_in, TM) f32  pixel features (channels on sublanes)
    y_ref      : (1,   TM) i32   pixel labels
    w_ref      : (NC, C_in) f32  1x1 conv weight
    b_ref      : (NC, 1)   f32   conv bias
    logits_ref : (NC,  TM) f32   per-pixel logits (model output tile)
    ce_ref     : (1,   TM) f32   per-pixel cross entropy
    """
    c_in = x_ref.shape[0]
    x = x_ref[...]                    # (C_in, TM)
    w = w_ref[...]                    # (NC, C_in)
    b = b_ref[...]                    # (NC, 1)

    # ---- model: 1x1 conv as C_in broadcasted FMAs on dense (NC, TM) tiles ----
    acc = w[:, 0:1] * x[0:1, :]                       # (NC,1)*(1,TM) -> (NC,TM)
    for k in range(1, c_in):
        acc = acc + w[:, k:k + 1] * x[k:k + 1, :]
    logits = acc + b                                  # (NC, TM)
    logits_ref[...] = logits.astype(logits_ref.dtype)

    # ---- loss: per-pixel CE, reducing over the NC sublane axis; all 2D ----
    labels = y_ref[...]                               # (1, TM) i32
    m = jnp.max(logits, axis=0, keepdims=True)        # (1, TM)
    lse = m + jnp.log(jnp.sum(jnp.exp(logits - m), axis=0, keepdims=True))
    cls = jax.lax.broadcasted_iota(jnp.int32, logits.shape, 0)      # (NC, TM)
    picked = jnp.sum(jnp.where(cls == labels, logits, 0.0),
                     axis=0, keepdims=True)           # logit[label], (1, TM)
    ce_ref[...] = lse - picked


def _pick_tile_m(m_total, requested):
    """Largest multiple of 128 that divides m_total and is <= requested."""
    t = min(requested, m_total)
    t = max((t // 128) * 128, 128)
    while m_total % t != 0:
        t -= 128
    return t


@functools.partial(jax.jit, static_argnames=("tile_m",))
def fullmodel_forward(inputs_nchw, labels, weight, bias, *, tile_m=16384):
    """Pallas equivalent of FullModel.forward.

    inputs_nchw : (N, C_in, H, W) f32
    labels      : (N, H, W)       i32
    weight      : (num_classes, C_in) f32   (PyTorch Conv2d weight[:, :, 0, 0])
    bias        : (num_classes,)      f32
    returns (loss[1], outputs[N, num_classes, H, W])
    """
    N, C_in, H, W = inputs_nchw.shape
    NC = weight.shape[0]
    M = N * H * W
    assert M % 128 == 0, "N*H*W must be a multiple of 128 (lane width)"
    tm = _pick_tile_m(M, tile_m)

    # Glue: NCHW -> channel-major (C, M) pixel matrix; labels -> (1, M).
    x_cm = jnp.transpose(inputs_nchw, (1, 0, 2, 3)).reshape(C_in, M)
    x_cm = x_cm.astype(jnp.float32)
    y_row = labels.reshape(1, M).astype(jnp.int32)
    w_mat = weight.astype(jnp.float32)                 # (NC, C_in)
    b_col = bias.reshape(NC, 1).astype(jnp.float32)    # (NC, 1)

    logits_cm, ce_row = pl.pallas_call(
        _fullmodel_kernel,
        out_shape=(
            jax.ShapeDtypeStruct((NC, M), jnp.float32),   # logits, channel-major
            jax.ShapeDtypeStruct((1, M), jnp.float32),    # per-pixel CE
        ),
        grid_spec=pltpu.PrefetchScalarGridSpec(
            num_scalar_prefetch=0,
            grid=(M // tm,),
            in_specs=[
                pl.BlockSpec((C_in, tm), lambda i: (0, i)),   # x tile
                pl.BlockSpec((1, tm), lambda i: (0, i)),      # labels tile
                pl.BlockSpec((NC, C_in), lambda i: (0, 0)),   # weight (resident)
                pl.BlockSpec((NC, 1), lambda i: (0, 0)),      # bias   (resident)
            ],
            out_specs=(
                pl.BlockSpec((NC, tm), lambda i: (0, i)),     # logits tile
                pl.BlockSpec((1, tm), lambda i: (0, i)),      # CE tile
            ),
        ),
        compiler_params=pltpu.CompilerParams(
            dimension_semantics=("parallel",),   # no cross-step state -> megacore OK
            vmem_limit_bytes=32 * 1024 * 1024,
        ),
        cost_estimate=pl.CostEstimate(
            flops=2 * M * C_in * NC + 6 * M * NC,
            transcendentals=M * (NC + 1),
            bytes_accessed=M * (4 * C_in + 4 + 4 * NC + 4) + 4 * NC * (C_in + 1),
        ),
    )(x_cm, y_row, w_mat, b_col)

    # Glue: channel-major logits -> NCHW; mean CE -> loss.unsqueeze(0).
    outputs = jnp.transpose(logits_cm.reshape(NC, N, H, W), (1, 0, 2, 3))
    loss = jnp.mean(ce_row).reshape(1)
    return loss, outputs


if __name__ == "__main__":
    # Small shapes: batch=2, C_in=4, spatial=16x16, num_classes=8  (M = 512).
    N, C_in, H, W, NC = 2, 4, 16, 16, 8

    key = jax.random.PRNGKey(0)
    k_x, k_y, k_w, k_b = jax.random.split(key, 4)

    inputs = jax.random.normal(k_x, (N, C_in, H, W), dtype=jnp.float32)
    labels = jax.random.randint(k_y, (N, H, W), 0, NC, dtype=jnp.int32)
    weight = jax.random.normal(k_w, (NC, C_in), dtype=jnp.float32) * 0.1
    bias = jax.random.normal(k_b, (NC,), dtype=jnp.float32) * 0.1

    loss, outputs = fullmodel_forward(inputs, labels, weight, bias)
    jax.block_until_ready((loss, outputs))

    # Pure-JAX reference check.
    x_rows = jnp.transpose(inputs, (0, 2, 3, 1)).reshape(-1, C_in)
    logits_rows = x_rows @ weight.T + bias
    logp = jax.nn.log_softmax(logits_rows, axis=-1)
    ce_ref = -jnp.mean(jnp.take_along_axis(logp, labels.reshape(-1, 1), axis=-1))
    out_ref = jnp.transpose(logits_rows.reshape(N, H, W, NC), (0, 3, 1, 2))

    assert loss.shape == (1,)
    assert outputs.shape == (N, NC, H, W)
    assert jnp.allclose(loss[0], ce_ref, atol=2e-5), (loss[0], ce_ref)
    assert jnp.allclose(outputs, out_ref, atol=2e-5)

    print("KERNEL_OK")
</pallas_src>

<mosaic_0001>
module attributes {stable_mosaic.version = 11 : i64} {
  func.func @_fullmodel_kernel(%arg0: i32, %arg1: memref<4x512xf32, #tpu.memory_space<vmem>>, %arg2: memref<1x512xi32, #tpu.memory_space<vmem>>, %arg3: memref<8x4xf32, #tpu.memory_space<vmem>>, %arg4: memref<8x1xf32, #tpu.memory_space<vmem>>, %arg5: memref<8x512xf32, #tpu.memory_space<vmem>>, %arg6: memref<1x512xf32, #tpu.memory_space<vmem>>) attributes {dimension_semantics = [#tpu.dimension_semantics<parallel>], iteration_bounds = array<i64: 1>, scalar_prefetch = 0 : i64, scratch_operands = 0 : i64, tpu.core_type = #tpu.core_type<tc>, window_params = [{transform_indices = @transform_0, window_bounds = array<i64: 4, 512>}, {transform_indices = @transform_1, window_bounds = array<i64: 1, 512>}, {pipeline_mode = #tpu.pipeline_mode<synchronous>, transform_indices = @transform_2, window_bounds = array<i64: 8, 4>}, {pipeline_mode = #tpu.pipeline_mode<synchronous>, transform_indices = @transform_3, window_bounds = array<i64: 8, 1>}, {transform_indices = @transform_4, window_bounds = array<i64: 8, 512>}, {transform_indices = @transform_5, window_bounds = array<i64: 1, 512>}]} {
    %c0 = arith.constant 0 : index
    %c0_0 = arith.constant 0 : index
    %0 = vector.load %arg1[%c0, %c0_0] : memref<4x512xf32, #tpu.memory_space<vmem>>, vector<4x512xf32>
    %c0_1 = arith.constant 0 : index
    %c0_2 = arith.constant 0 : index
    %1 = vector.load %arg3[%c0_1, %c0_2] : memref<8x4xf32, #tpu.memory_space<vmem>>, vector<8x4xf32>
    %c0_3 = arith.constant 0 : index
    %c0_4 = arith.constant 0 : index
    %2 = vector.load %arg4[%c0_3, %c0_4] : memref<8x1xf32, #tpu.memory_space<vmem>>, vector<8x1xf32>
    %3 = vector.extract_strided_slice %1 {offsets = [0, 0], sizes = [8, 1], strides = [1, 1]} : vector<8x4xf32> to vector<8x1xf32>
    %4 = vector.extract_strided_slice %0 {offsets = [0, 0], sizes = [1, 512], strides = [1, 1]} : vector<4x512xf32> to vector<1x512xf32>
    %5 = vector.broadcast %3 : vector<8x1xf32> to vector<8x512xf32>
    %6 = vector.broadcast %4 : vector<1x512xf32> to vector<8x512xf32>
    %7 = arith.mulf %5, %6 : vector<8x512xf32>
    %8 = vector.extract_strided_slice %1 {offsets = [0, 1], sizes = [8, 1], strides = [1, 1]} : vector<8x4xf32> to vector<8x1xf32>
    %9 = vector.extract_strided_slice %0 {offsets = [1, 0], sizes = [1, 512], strides = [1, 1]} : vector<4x512xf32> to vector<1x512xf32>
    %10 = vector.broadcast %8 : vector<8x1xf32> to vector<8x512xf32>
    %11 = vector.broadcast %9 : vector<1x512xf32> to vector<8x512xf32>
    %12 = arith.mulf %10, %11 : vector<8x512xf32>
    %13 = arith.addf %7, %12 : vector<8x512xf32>
    %14 = vector.extract_strided_slice %1 {offsets = [0, 2], sizes = [8, 1], strides = [1, 1]} : vector<8x4xf32> to vector<8x1xf32>
    %15 = vector.extract_strided_slice %0 {offsets = [2, 0], sizes = [1, 512], strides = [1, 1]} : vector<4x512xf32> to vector<1x512xf32>
    %16 = vector.broadcast %14 : vector<8x1xf32> to vector<8x512xf32>
    %17 = vector.broadcast %15 : vector<1x512xf32> to vector<8x512xf32>
    %18 = arith.mulf %16, %17 : vector<8x512xf32>
    %19 = arith.addf %13, %18 : vector<8x512xf32>
    %20 = vector.extract_strided_slice %1 {offsets = [0, 3], sizes = [8, 1], strides = [1, 1]} : vector<8x4xf32> to vector<8x1xf32>
    %21 = vector.extract_strided_slice %0 {offsets = [3, 0], sizes = [1, 512], strides = [1, 1]} : vector<4x512xf32> to vector<1x512xf32>
    %22 = vector.broadcast %20 : vector<8x1xf32> to vector<8x512xf32>
    %23 = vector.broadcast %21 : vector<1x512xf32> to vector<8x512xf32>
    %24 = arith.mulf %22, %23 : vector<8x512xf32>
    %25 = arith.addf %19, %24 : vector<8x512xf32>
    %26 = vector.broadcast %2 : vector<8x1xf32> to vector<8x512xf32>
    %27 = arith.addf %25, %26 : vector<8x512xf32>
    %c0_5 = arith.constant 0 : index
    %c0_6 = arith.constant 0 : index
    %28 = vector.load %arg5[%c0_5, %c0_6] : memref<8x512xf32, #tpu.memory_space<vmem>>, vector<8x512xf32>
    tpu.vector_store %arg5[%c0_5, %c0_6], %27 {strides = array<i32>} : memref<8x512xf32, #tpu.memory_space<vmem>>, vector<8x512xf32>,
    %c0_7 = arith.constant 0 : index
    %c0_8 = arith.constant 0 : index
    %29 = vector.load %arg2[%c0_7, %c0_8] : memref<1x512xi32, #tpu.memory_space<vmem>>, vector<1x512xi32>
    %cst = arith.constant dense<0xFF800000> : vector<512xf32>
    %30 = vector.multi_reduction <maximumf>, %27, %cst [0] : vector<8x512xf32> to vector<512xf32>
    %31 = vector.shape_cast %30 : vector<512xf32> to vector<1x512xf32>
    %32 = vector.broadcast %31 : vector<1x512xf32> to vector<8x512xf32>
    %33 = arith.subf %27, %32 : vector<8x512xf32>
    %34 = math.exp %33 : vector<8x512xf32>
    %cst_9 = arith.constant dense<0.000000e+00> : vector<512xf32>
    %35 = vector.multi_reduction <add>, %34, %cst_9 [0] : vector<8x512xf32> to vector<512xf32>
    %36 = vector.shape_cast %35 : vector<512xf32> to vector<1x512xf32>
    %37 = math.log %36 : vector<1x512xf32>
    %38 = arith.addf %31, %37 : vector<1x512xf32>
    %39 = tpu.iota {dimensions = array<i32: 0>} : vector<8x512xi32>
    %40 = vector.broadcast %29 : vector<1x512xi32> to vector<8x512xi32>
    %41 = arith.cmpi eq, %39, %40 : vector<8x512xi32>
    %cst_10 = arith.constant 0.000000e+00 : f32
    %42 = vector.broadcast %cst_10 : f32 to vector<8x512xf32>
    %43 = arith.select %41, %27, %42 : vector<8x512xi1>, vector<8x512xf32>
    %cst_11 = arith.constant dense<0.000000e+00> : vector<512xf32>
    %44 = vector.multi_reduction <add>, %43, %cst_11 [0] : vector<8x512xf32> to vector<512xf32>
    %45 = vector.shape_cast %44 : vector<512xf32> to vector<1x512xf32>
    %46 = arith.subf %38, %45 : vector<1x512xf32>
    %c0_12 = arith.constant 0 : index
    %c0_13 = arith.constant 0 : index
    %47 = vector.load %arg6[%c0_12, %c0_13] : memref<1x512xf32, #tpu.memory_space<vmem>>, vector<1x512xf32>
    tpu.vector_store %arg6[%c0_12, %c0_13], %46 {strides = array<i32>} : memref<1x512xf32, #tpu.memory_space<vmem>>, vector<1x512xf32>,
    return
  }
  func.func @transform_0(%arg0: i32) -> (i32, i32) {
    %c0_i32 = arith.constant 0 : i32
    %c0_i32_0 = arith.constant 0 : i32
    return %c0_i32, %arg0 : i32, i32
  }
  func.func @transform_1(%arg0: i32) -> (i32, i32) {
    %c0_i32 = arith.constant 0 : i32
    %c0_i32_0 = arith.constant 0 : i32
    return %c0_i32, %arg0 : i32, i32
  }
  func.func @transform_2(%arg0: i32) -> (i32, i32) {
    %c0_i32 = arith.constant 0 : i32
    %c0_i32_0 = arith.constant 0 : i32
    %c0_i32_1 = arith.constant 0 : i32
    return %c0_i32, %c0_i32_0 : i32, i32
  }
  func.func @transform_3(%arg0: i32) -> (i32, i32) {
    %c0_i32 = arith.constant 0 : i32
    %c0_i32_0 = arith.constant 0 : i32
    %c0_i32_1 = arith.constant 0 : i32
    return %c0_i32, %c0_i32_0 : i32, i32
  }
  func.func @transform_4(%arg0: i32) -> (i32, i32) {
    %c0_i32 = arith.constant 0 : i32
    %c0_i32_0 = arith.constant 0 : i32
    return %c0_i32, %arg0 : i32, i32
  }
  func.func @transform_5(%arg0: i32) -> (i32, i32) {
    %c0_i32 = arith.constant 0 : i32
    %c0_i32_0 = arith.constant 0 : i32
    return %c0_i32, %arg0 : i32, i32
  }
}

</mosaic_0001>

<bundles_post_ra>
// kernel: fullmodel_forward.1
= control target key start
LH: loop header
LB: loop body
LE: loop exit
PB: predicated region body
PF: predicated region fallthrough
CT: control target
= control target key end

     0   :  { %v423_v0 = vmov 0   ;;  %v424_v2 = vmov 2   ;;  %v425_v3 = vmov 1   ;;  %v426_v4 = vmov 3   ;;  %s585_s2 = inlined_call_operand.vmem [shape: f32[8,4], index: 2, kind: input, shape index: {}]   ;;  %s586_s3 = inlined_call_operand.vmem [shape: f32[8,1], index: 3, kind: input, shape index: {}]   ;;  %s587_s0 = inlined_call_operand.vmem [shape: f32[4,512], index: 0, kind: input, shape index: {}]   ;;  %s588_s4 = inlined_call_operand.vmem [shape: f32[8,512], index: 4, kind: output, shape index: {0}]   ;;  %s589_s1 = inlined_call_operand.vmem [shape: s32[1,512], index: 1, kind: input, shape index: {}]   ;;  %s590_s5 = inlined_call_operand.vmem [shape: f32[1,512], index: 5, kind: output, shape index: {1}]  }
   0x1   :  { %401 = vset.pattern.permute.xlu0 %v423_v0  ;;  %v21_v1 = vld [vmem:[%s585_s2] sm:$0xff]  ;;  %403 = vset.pattern.permute.xlu1 %v424_v2  ;;  %v30_v6 = vlaneseq  ;;  %v20_v11 = vld [vmem:[%s587_s0 + $0x8] sm:$0xff] }
   0x2   :  { %25 = vperm.xlu0 %401, %v21_v1   ;;  %119 = vperm.xlu1 %403, %v21_v1   ;;  %v22_v5 = vld [vmem:[%s586_s3] sm:$0xff] }
   0x3   :  { %v465_v7 = vshrl.u32 %v30_v6, 7  ;;  %v19_v10 = vld [vmem:[%s587_s0] sm:$0xff]  ;;  %vm385_vm4 = vcmp.lt.s32.totalorder %v30_v6, 512 }
   0x5   :  { %v468_v8 = vsub.s32 0, %v465_v7  ;;  %v36_v9 = vsub.s32 4, %v465_v7  ;;  %v478_v12 = vsub.s32 2, %v465_v7  ;;  %v128_v13 = vsub.s32 6, %v465_v7 }
   0x6   :  { %402 = vset.pattern.permute.xlu0 %v425_v3  ;;  %404 = vset.pattern.permute.xlu1 %v426_v4  ;;  %v482_v14 = vsub.s32 1, %v465_v7  ;;  %v80_v15 = vsub.s32 5, %v465_v7  ;;  %v486_v16 = vsub.s32 3, %v465_v7  ;;  %v176_v17 = vsub.s32 7, %v465_v7 }
   0x7   :  { %71 = vperm.xlu0 %402, %v21_v1   ;;  %167 = vperm.xlu1 %404, %v21_v1   ;;  %v33_v18 = vrot.slane %v19_v10, %v468_v8  ;;  %v37_v19 = vrot.slane %v19_v10, %v36_v9  ;;  %v41_v20 = vrot.slane %v20_v11, %v468_v8 }
   0x8   :  { %v45_v21 = vrot.slane %v20_v11, %v36_v9  ;;  %v125_v22 = vrot.slane %v19_v10, %v478_v12  ;;  %v129_v23 = vrot.slane %v19_v10, %v128_v13  ;;  %v133_v24 = vrot.slane %v20_v11, %v478_v12 }
   0x9   :  { %v137_v25 = vrot.slane %v20_v11, %v128_v13  ;;  %v77_v26 = vrot.slane %v19_v10, %v482_v14  ;;  %v81_v27 = vrot.slane %v19_v10, %v80_v15  ;;  %v85_v28 = vrot.slane %v20_v11, %v482_v14 }
   0xa   :  { %v89_v29 = vrot.slane %v20_v11, %v80_v15  ;;  %v173_v30 = vrot.slane %v19_v10, %v486_v16  ;;  %v177_v31 = vrot.slane %v19_v10, %v176_v17  ;;  %v181_v32 = vrot.slane %v20_v11, %v486_v16 }
   0xb   :  { %405 = vset.pattern.permute.xlu1 %v423_v0  ;;  %406 = vset.pattern.permute.xlu0 %v423_v0  ;;  %v185_v33 = vrot.slane %v20_v11, %v176_v17  ;;  %v53_v35 = vrot.slane %v33_v18, %v468_v8  ;;  %v57_v36 = vrot.slane %v37_v19, %v468_v8 }
   0xc   :  { %216 = vperm.xlu1 %405, %v22_v5   ;;  %v61_v37 = vrot.slane %v41_v20, %v468_v8  ;;  %v65_v38 = vrot.slane %v45_v21, %v468_v8  ;;  %v145_v40 = vrot.slane %v125_v22, %v478_v12  ;;  %v149_v41 = vrot.slane %v129_v23, %v478_v12 }
   0xd   :  { %v153_v42 = vrot.slane %v133_v24, %v478_v12  ;;  %v157_v43 = vrot.slane %v137_v25, %v478_v12  ;;  %v97_v44 = vrot.slane %v77_v26, %v482_v14  ;;  %v101_v45 = vrot.slane %v81_v27, %v482_v14 }
   0xe   :  { %v105_v46 = vrot.slane %v85_v28, %v482_v14  ;;  %v109_v47 = vrot.slane %v89_v29, %v482_v14  ;;  %v193_v48 = vrot.slane %v173_v30, %v486_v16  ;;  %v197_v49 = vrot.slane %v177_v31, %v486_v16 }
   0xf   :  { %v201_v50 = vrot.slane %v181_v32, %v486_v16  ;;  %v205_v51 = vrot.slane %v185_v33, %v486_v16 }
  0x7d   :  { %v26_v34 = vpop.permute.xlu0 %25  ;;  %v120_v39 = vpop.permute.xlu1 %119 }
  0x7e   :  { %v66_v52 = vmul.f32 %v53_v35, %v26_v34  ;;  %v67_v53 = vmul.f32 %v57_v36, %v26_v34  ;;  %v68_v54 = vmul.f32 %v61_v37, %v26_v34  ;;  %v69_v55 = vmul.f32 %v65_v38, %v26_v34 }
  0x7f   :  { %v158_v56 = vmul.f32 %v145_v40, %v120_v39  ;;  %v159_v57 = vmul.f32 %v149_v41, %v120_v39  ;;  %v160_v58 = vmul.f32 %v153_v42, %v120_v39  ;;  %v161_v59 = vmul.f32 %v157_v43, %v120_v39 }
  0x82   :  { %v72_v60 = vpop.permute.xlu0 %71  ;;  %v168_v61 = vpop.permute.xlu1 %167 }
  0x83   :  { %v110_v62 = vmul.f32 %v97_v44, %v72_v60  ;;  %v111_v63 = vmul.f32 %v101_v45, %v72_v60  ;;  %v112_v0 = vmul.f32 %v105_v46, %v72_v60  ;;  %v113_v1 = vmul.f32 %v109_v47, %v72_v60 }
  0x84   :  { %v206_v2 = vmul.f32 %v193_v48, %v168_v61  ;;  %v207_v3 = vmul.f32 %v197_v49, %v168_v61  ;;  %v208_v4 = vmul.f32 %v201_v50, %v168_v61  ;;  %v209_v5 = vmul.f32 %v205_v51, %v168_v61  ;;  %v227_v61 = vld [vmem:[%s589_s1] sm:$0xf] }
  0x85   :  { %v114_v9 = vadd.f32 %v110_v62, %v66_v52  ;;  %v115_v10 = vadd.f32 %v111_v63, %v67_v53  ;;  %v116_v11 = vadd.f32 %v112_v0, %v68_v54  ;;  %v117_v13 = vadd.f32 %v113_v1, %v69_v55 }
  0x86   :  { %v305_v62 = vrot.slane %v227_v61, %v468_v8  ;;  %v309_v0 = vrot.slane %v227_v61, %v482_v14 }
  0x87   :  { %v162_v15 = vadd.f32 %v158_v56, %v114_v9  ;;  %v163_v17 = vadd.f32 %v159_v57, %v115_v10  ;;  %v164_v18 = vadd.f32 %v160_v58, %v116_v11  ;;  %v165_v19 = vadd.f32 %v161_v59, %v117_v13  ;;  %v217_v20 = vpop.permute.xlu1 %216 }
  0x88   :  { %v317_v9 = vrot.slane %v227_v61, %v486_v16  ;;  %vm318_vm0 = vcmp.eq.s32.totalorder %v465_v7, %v305_v62  ;;  %vm319_vm1 = vcmp.eq.s32.totalorder %v465_v7, %v309_v0 }
  0x89   :  { %v210_v21 = vadd.f32 %v206_v2, %v162_v15  ;;  %v211_v22 = vadd.f32 %v207_v3, %v163_v17  ;;  %v212_v23 = vadd.f32 %v208_v4, %v164_v18  ;;  %v213_v24 = vadd.f32 %v209_v5, %v165_v19 }
  0x8a   :  { %v313_v3 = vrot.slane %v227_v61, %v478_v12  ;;  %vm321_vm3 = vcmp.eq.s32.totalorder %v465_v7, %v317_v9 }
  0x8b   :  { %v513_v25 = vadd.f32 %v217_v20, %v210_v21  ;;  %v515_v26 = vadd.f32 %v217_v20, %v211_v22  ;;  %v517_v27 = vadd.f32 %v217_v20, %v212_v23  ;;  %v519_v28 = vadd.f32 %v217_v20, %v213_v24 }
  0x8c   :  { %vm320_vm2 = vcmp.eq.s32.totalorder %v465_v7, %v313_v3 }
  0x8d   :  { %223 = vst [vmem:[%s588_s4] sm:$0xff] %v513_v25  ;;  %224 = vst [vmem:[%s588_s4 + $0x8] sm:$0xff] %v515_v26  ;;  %v228_v29 = vrot.slane %v513_v25, 4  ;;  %v234_v30 = vrot.slane %v515_v26, 4  ;;  %v240_v31 = vrot.slane %v517_v27, 4  ;;  %v246_v32 = vrot.slane %v519_v28, 4 }
  0x8e   :  { %225 = vst [vmem:[%s588_s4 + $0x10] sm:$0xff] %v517_v27  ;;  %226 = vst [vmem:[%s588_s4 + $0x18] sm:$0xff] %v519_v28  ;;  %v322_v12 = vsel %vm318_vm0, %v513_v25, 0.0  ;;  %v323_v21 = vsel %vm319_vm1, %v515_v26, 0.0  ;;  %v324_v24 = vsel %vm320_vm2, %v517_v27, 0.0 }
  0x8f   :  { %v229_v33 = vmax.f32 %v513_v25, %v228_v29  ;;  %v235_v34 = vmax.f32 %v515_v26, %v234_v30  ;;  %v241_v35 = vmax.f32 %v517_v27, %v240_v31  ;;  %v247_v36 = vmax.f32 %v519_v28, %v246_v32 }
  0x90   :  { %v325_v31 = vsel %vm321_vm3, %v519_v28, 0.0  ;;  %v326_v32 = vrot.slane %v322_v12, 4 }
  0x91   :  { %v230_v37 = vrot.slane %v229_v33, 2  ;;  %v236_v38 = vrot.slane %v235_v34, 2  ;;  %v242_v39 = vrot.slane %v241_v35, 2  ;;  %v248_v40 = vrot.slane %v247_v36, 2 }
  0x93   :  { %v231_v41 = vmax.f32 %v229_v33, %v230_v37  ;;  %v237_v42 = vmax.f32 %v235_v34, %v236_v38  ;;  %v243_v43 = vmax.f32 %v241_v35, %v242_v39  ;;  %v249_v44 = vmax.f32 %v247_v36, %v248_v40 }
  0x94   :  { %v332_v35 = vrot.slane %v323_v21, 4  ;;  %v338_v38 = vrot.slane %v324_v24, 4  ;;  %v344_v40 = vrot.slane %v325_v31, 4 }
  0x95   :  { %v232_v45 = vrot.slane %v231_v41, 1  ;;  %v238_v46 = vrot.slane %v237_v42, 1  ;;  %v244_v47 = vrot.slane %v243_v43, 1  ;;  %v250_v48 = vrot.slane %v249_v44, 1 }
  0x97   :  { %v545_v49 = vmax.f32 %v231_v41, %v232_v45  ;;  %v547_v50 = vmax.f32 %v237_v42, %v238_v46  ;;  %v549_v51 = vmax.f32 %v243_v43, %v244_v47  ;;  %v551_v52 = vmax.f32 %v249_v44, %v250_v48 }
  0x98   :  { %v339_v43 = vadd.f32 %v338_v38, %v324_v24 }
  0x99   :  { %v252_v53 = vsub.f32 %v513_v25, %v545_v49  ;;  %v253_v54 = vsub.f32 %v515_v26, %v547_v50  ;;  %v254_v55 = vsub.f32 %v517_v27, %v549_v51  ;;  %v255_v56 = vsub.f32 %v519_v28, %v551_v52 }
  0x9a   :  { %v327_v26 = vadd.f32 %v326_v32, %v322_v12  ;;  %v333_v27 = vadd.f32 %v332_v35, %v323_v21  ;;  %v345_v28 = vadd.f32 %v344_v40, %v325_v31  ;;  %v340_v46 = vrot.slane %v339_v43, 2 }
  0x9b   :  { %v256_v57 = vmul.f32 1.442695, %v252_v53  ;;  %v258_v58 = vmul.f32 1.442695, %v253_v54  ;;  %v260_v59 = vmul.f32 1.442695, %v254_v55 }
  0x9c   :  { %v262_v60 = vmul.f32 1.442695, %v255_v56  ;;  %v328_v44 = vrot.slane %v327_v26, 2  ;;  %v334_v45 = vrot.slane %v333_v27, 2  ;;  %v346_v47 = vrot.slane %v345_v28, 2 }
  0x9d   :  { %407 = vpow2.f32 %v256_v57  ;;  %v341_v54 = vadd.f32 %v340_v46, %v339_v43  ;;  %v427_v55 = vmov 1966171168  }
  0x9e   :  { %409 = vpow2.f32 %v258_v58  ;;  %v329_v48 = vadd.f32 %v328_v44, %v327_v26  ;;  %v335_v53 = vadd.f32 %v334_v45, %v333_v27  ;;  %v361_v56 = vunpack.c.l.s4 %v427_v55 }
  0x9f   :  { %411 = vpow2.f32 %v260_v59  ;;  %v347_v57 = vadd.f32 %v346_v47, %v345_v28 }
  0xa0   :  { %413 = vpow2.f32 %v262_v60  ;;  %v330_v58 = vrot.slane %v329_v48, 1  ;;  %v336_v60 = vrot.slane %v335_v53, 1 }
  0xa1   :  { %v348_v3 = vrot.slane %v347_v57, 1 }
  0xa3   :  { %v349_v12 = vadd.f32 %v348_v3, %v347_v57 }
  0xaa   :  { %v408_v63 = vpop.eup %407 }
  0xab   :  { %v410_v1 = vpop.eup %409  ;;  %v264_v2 = vrot.slane %v408_v63, 4 }
  0xac   :  { %v412_v4 = vpop.eup %411  ;;  %v270_v5 = vrot.slane %v410_v1, 4 }
  0xad   :  { %v414_v10 = vpop.eup %413  ;;  %v265_v11 = vadd.f32 %v408_v63, %v264_v2  ;;  %v276_v13 = vrot.slane %v412_v4, 4  ;;  %v342_v63 = vrot.slane %v341_v54, 1 }
  0xae   :  { %v271_v15 = vadd.f32 %v410_v1, %v270_v5  ;;  %v282_v17 = vrot.slane %v414_v10, 4  ;;  %v362_v1 = vunpack.c.0.s8 %v361_v56 }
  0xaf   :  { %v266_v8 = vrot.slane %v265_v11, 2  ;;  %v277_v18 = vadd.f32 %v412_v4, %v276_v13 }
  0xb0   :  { %v272_v14 = vrot.slane %v271_v15, 2  ;;  %v283_v19 = vadd.f32 %v414_v10, %v282_v17  ;;  %v331_v10 = vadd.f32 %v330_v58, %v329_v48 }
  0xb1   :  { %v267_v16 = vadd.f32 %v266_v8, %v265_v11  ;;  %v278_v20 = vrot.slane %v277_v18, 2  ;;  %v343_v8 = vadd.f32 %v342_v63, %v341_v54 }
  0xb2   :  { %v273_v22 = vadd.f32 %v272_v14, %v271_v15  ;;  %v284_v23 = vrot.slane %v283_v19, 2  ;;  %v337_v15 = vadd.f32 %v336_v60, %v335_v53  ;;  %v365_v14 = vsub.s32 %v362_v1, %v465_v7 }
  0xb3   :  { %v268_v29 = vrot.slane %v267_v16, 1  ;;  %v279_v30 = vadd.f32 %v278_v20, %v277_v18 }
  0xb4   :  { %v274_v33 = vrot.slane %v273_v22, 1  ;;  %v285_v34 = vadd.f32 %v284_v23, %v283_v19 }
  0xb5   :  { %v269_v36 = vadd.f32 %v268_v29, %v267_v16  ;;  %v280_v37 = vrot.slane %v279_v30, 1 }
  0xb6   :  { %v275_v25 = vadd.f32 %v274_v33, %v273_v22  ;;  %v286_v39 = vrot.slane %v285_v34, 1 }
  0xb7   :  { %v281_v41 = vadd.f32 %v280_v37, %v279_v30  ;;  %415 = vlog2.f32 %v269_v36 }
  0xb8   :  { %v287_v42 = vadd.f32 %v286_v39, %v285_v34  ;;  %417 = vlog2.f32 %v275_v25 }
  0xb9   :  { %419 = vlog2.f32 %v281_v41 }
  0xba   :  { %421 = vlog2.f32 %v287_v42 }
  0xc4   :  { %v416_v59 = vpop.eup %415 }
  0xc5   :  { %v418_v61 = vpop.eup %417  ;;  %v289_v62 = vmul.f32 0.6931472, %v416_v59 }
  0xc6   :  { %v420_v0 = vpop.eup %419  ;;  %v291_v2 = vmul.f32 0.6931472, %v418_v61 }
  0xc7   :  { %v422_v4 = vpop.eup %421  ;;  %v293_v5 = vmul.f32 0.6931472, %v420_v0  ;;  %v296_v9 = vadd.f32 %v289_v62, %v545_v49 }
  0xc8   :  { %v295_v11 = vmul.f32 0.6931472, %v422_v4  ;;  %v297_v13 = vadd.f32 %v291_v2, %v547_v50 }
  0xc9   :  { %v298_v17 = vadd.f32 %v293_v5, %v549_v51  ;;  %v350_v18 = vsub.f32 %v296_v9, %v331_v10 }
  0xca   :  { %v299_v19 = vadd.f32 %v295_v11, %v551_v52  ;;  %v351_v16 = vsub.f32 %v297_v13, %v337_v15 }
  0xcb   :  { %v352_v20 = vsub.f32 %v298_v17, %v343_v8 }
  0xcc   :  { %v353_v21 = vsub.f32 %v299_v19, %v349_v12  ;;  %v358_v22 = vcombine.low %v350_v18, %v351_v16 }
  0xce   :  { %v359_v23 = vcombine.low %v352_v20, %v353_v21  ;;  %v366_v49 = vrot.slane %v358_v22, %v365_v14 }
  0xd0   :  { %v373_v24 = vrot.slane %v359_v23, %v365_v14 }
  0xd2   :  { %v374_v29 = vcombine.low %v366_v49, %v373_v24 }
  0xd4   :  { %v381_v50 = vrot.slane %v374_v29, %v365_v14 }
  0xd6   :  { %387 = vst.msk [vmem:[%s590_s5] sm:$0xf] %vm385_vm4, %v381_v50 }

</bundles_post_ra>
